<compile_context>
chip_gen: v7x
topology: tpu7x:2x2x1
jax: 0.10.0
libtpu: 0.0.40
codegen_flags: <defaults>
</compile_context>

<pallas_src>
import functools
import math

import jax
import jax.numpy as jnp
from jax import lax
from jax.experimental import pallas as pl
from jax.experimental.pallas import tpu as pltpu


def mha_kernel(x_ref, wqkv_ref, bqkv_ref, wo_ref, bo_ref, out_ref, *,
               num_heads, head_dim, compute_dtype):
    T, E = x_ref.shape[1], x_ref.shape[2]
    cd = compute_dtype

    x = x_ref[0].astype(cd)                                        # (T, E)

    # Fused QKV projection: (T, E) @ (E, 3E) + (1, 3E).  Scale already folded
    # into the Q columns by the wrapper.
    qkv = jnp.dot(x, wqkv_ref[...].astype(cd),
                  preferred_element_type=jnp.float32) + bqkv_ref[...]  # (T, 3E) f32

    def heads(mat):                                                # (T, E) -> (H, T, hd)
        return jnp.transpose(mat.reshape(T, num_heads, head_dim), (1, 0, 2))

    q = heads(qkv[:, :E])
    k = heads(qkv[:, E:2 * E])
    v = heads(qkv[:, 2 * E:])

    # Per-head attention scores with causal mask (large finite negative is
    # robust and equivalent here: exp underflows to exactly 0).
    s = jnp.einsum('htd,hsd->hts', q.astype(cd), k.astype(cd),
                   preferred_element_type=jnp.float32)             # (H, T, T)
    row = lax.broadcasted_iota(jnp.int32, (T, T), 0)
    col = lax.broadcasted_iota(jnp.int32, (T, T), 1)
    s = jnp.where((col > row)[None, :, :], -1e30, s)

    # Softmax with deferred normalization.
    m = jnp.max(s, axis=-1, keepdims=True)                         # (H, T, 1)
    p = jnp.exp(s - m)                                             # (H, T, T) f32
    denom = jnp.sum(p, axis=-1, keepdims=True)                     # (H, T, 1)
    # TODO(synk): nn.Dropout(drop_rate) on attention weights is identity in eval mode; not applied.

    ctx = jnp.einsum('hts,hsd->htd', p.astype(cd), v.astype(cd),
                     preferred_element_type=jnp.float32)           # (H, T, hd)
    ctx = ctx * pl.reciprocal(denom, approx=True)                  # normalize on (H,T,hd)

    # Concatenate heads -> (T, E) and apply out_proj in one matmul.
    ctx = jnp.transpose(ctx, (1, 0, 2)).reshape(T, E)
    out = jnp.dot(ctx.astype(cd), wo_ref[...].astype(cd),
                  preferred_element_type=jnp.float32) + bo_ref[...]
    out_ref[0] = out.astype(out_ref.dtype)


def multi_head_attention(x, params, num_heads, compute_dtype=jnp.float32):
    wq, wk, wv, bq, bk, bv, wo, bo = params
    B, T, E = x.shape
    hd = E // num_heads
    scale = 1.0 / math.sqrt(hd)

    # Plain-JAX glue: fold the attention scale into Q, pack QKV column-wise,
    # pre-transpose the output projection.
    wqkv = jnp.concatenate([(wq * scale).T, wk.T, wv.T], axis=1)    # (E, 3E)
    bqkv = jnp.concatenate([bq * scale, bk, bv]).reshape(1, 3 * E)  # (1, 3E)
    wo_t = wo.T                                                     # (E, E)
    bo2 = bo.reshape(1, E)                                          # (1, E)

    kernel = functools.partial(mha_kernel, num_heads=num_heads,
                               head_dim=hd, compute_dtype=compute_dtype)

    def full(shape):  # whole array resident in VMEM, fetched once (constant index_map)
        return pl.BlockSpec(shape, lambda b: (0,) * len(shape))

    return pl.pallas_call(
        kernel,
        out_shape=jax.ShapeDtypeStruct((B, T, E), x.dtype),
        grid_spec=pltpu.PrefetchScalarGridSpec(
            num_scalar_prefetch=0,
            grid=(B,),
            in_specs=[
                pl.BlockSpec((1, T, E), lambda b: (b, 0, 0)),       # x
                full((E, 3 * E)),                                   # packed W_qkv
                full((1, 3 * E)),                                   # packed b_qkv
                full((E, E)),                                       # W_o^T
                full((1, E)),                                       # b_o
            ],
            out_specs=pl.BlockSpec((1, T, E), lambda b: (b, 0, 0)),
        ),
        compiler_params=pltpu.CompilerParams(
            dimension_semantics=("parallel",)),
    )(x, wqkv, bqkv, wo_t, bo2)


def reference_mha(x, params, num_heads):
    # Pure-JAX reference replicating the PyTorch forward (dropout in eval mode).
    wq, wk, wv, bq, bk, bv, wo, bo = params
    B, T, E = x.shape
    hd = E // num_heads

    def split(t):
        return t.reshape(B, T, num_heads, hd).transpose(0, 2, 1, 3)

    q = split(x @ wq.T + bq)
    k = split(x @ wk.T + bk)
    v = split(x @ wv.T + bv)
    scores = q @ k.transpose(0, 1, 3, 2)
    mask = jnp.triu(jnp.ones((T, T), dtype=bool), 1)
    scores = jnp.where(mask, -jnp.inf, scores)
    w = jax.nn.softmax(scores / hd ** 0.5, axis=-1)
    ctx = (w @ v).transpose(0, 2, 1, 3).reshape(B, T, E)
    return ctx @ wo.T + bo


if __name__ == "__main__":
    # Config: embdg_dim=32, n_heads=4, context_length=8, qkv_bias=True, drop_rate=0.0 (eval).
    B, T, E, H = 2, 8, 32, 4

    key = jax.random.PRNGKey(0)
    ks = jax.random.split(key, 9)
    params = (
        0.1 * jax.random.normal(ks[0], (E, E), jnp.float32),   # query_w.weight (E_out, E_in)
        0.1 * jax.random.normal(ks[1], (E, E), jnp.float32),   # key_w.weight
        0.1 * jax.random.normal(ks[2], (E, E), jnp.float32),   # value_w.weight
        0.1 * jax.random.normal(ks[3], (E,), jnp.float32),     # query_w.bias
        0.1 * jax.random.normal(ks[4], (E,), jnp.float32),     # key_w.bias
        0.1 * jax.random.normal(ks[5], (E,), jnp.float32),     # value_w.bias
        0.1 * jax.random.normal(ks[6], (E, E), jnp.float32),   # out_proj.weight
        0.1 * jax.random.normal(ks[7], (E,), jnp.float32),     # out_proj.bias
    )
    x = jax.random.normal(ks[8], (B, T, E), jnp.float32)

    out = multi_head_attention(x, params, H)
    out = jax.block_until_ready(out)

    ref = reference_mha(x, params, H)
    assert out.shape == (B, T, E)
    # Tolerance slightly loosened vs exact f32 because of the approx (EUP)
    # reciprocal in the deferred softmax normalization.
    assert jnp.allclose(out, ref, atol=1e-3, rtol=1e-3), "Pallas output mismatch vs reference"
    print("KERNEL_OK")
</pallas_src>

<mosaic_0001>
module attributes {stable_mosaic.version = 11 : i64} {
  func.func @mha_kernel(%arg0: i32, %arg1: memref<1x8x32xf32, #tpu.memory_space<vmem>>, %arg2: memref<32x96xf32, #tpu.memory_space<vmem>>, %arg3: memref<1x96xf32, #tpu.memory_space<vmem>>, %arg4: memref<32x32xf32, #tpu.memory_space<vmem>>, %arg5: memref<1x32xf32, #tpu.memory_space<vmem>>, %arg6: memref<1x8x32xf32, #tpu.memory_space<vmem>>) attributes {dimension_semantics = [#tpu.dimension_semantics<parallel>], iteration_bounds = array<i64: 2>, scalar_prefetch = 0 : i64, scratch_operands = 0 : i64, tpu.core_type = #tpu.core_type<tc>, window_params = [{transform_indices = @transform_0, window_bounds = array<i64: 1, 8, 32>}, {pipeline_mode = #tpu.pipeline_mode<synchronous>, transform_indices = @transform_1, window_bounds = array<i64: 32, 96>}, {pipeline_mode = #tpu.pipeline_mode<synchronous>, transform_indices = @transform_2, window_bounds = array<i64: 1, 96>}, {pipeline_mode = #tpu.pipeline_mode<synchronous>, transform_indices = @transform_3, window_bounds = array<i64: 32, 32>}, {pipeline_mode = #tpu.pipeline_mode<synchronous>, transform_indices = @transform_4, window_bounds = array<i64: 1, 32>}, {transform_indices = @transform_5, window_bounds = array<i64: 1, 8, 32>}]} {
    %c0 = arith.constant 0 : index
    %c0_0 = arith.constant 0 : index
    %c0_1 = arith.constant 0 : index
    %0 = vector.load %arg1[%c0, %c0_0, %c0_1] : memref<1x8x32xf32, #tpu.memory_space<vmem>>, vector<1x8x32xf32>
    %1 = vector.shape_cast %0 : vector<1x8x32xf32> to vector<8x32xf32>
    %c0_2 = arith.constant 0 : index
    %c0_3 = arith.constant 0 : index
    %2 = vector.load %arg2[%c0_2, %c0_3] : memref<32x96xf32, #tpu.memory_space<vmem>>, vector<32x96xf32>
    %cst = arith.constant dense<0.000000e+00> : vector<8x96xf32>
    %3 = tpu.matmul %1, %2, %cst {dimension_numbers = #tpu.dot_dimension_numbers<[1], [0], [0], [1], [0, 0, 1, 1], [], []>} : vector<8x32xf32>, vector<32x96xf32>, vector<8x96xf32> -> vector<8x96xf32>
    %c0_4 = arith.constant 0 : index
    %c0_5 = arith.constant 0 : index
    %4 = vector.load %arg3[%c0_4, %c0_5] : memref<1x96xf32, #tpu.memory_space<vmem>>, vector<1x96xf32>
    %5 = vector.broadcast %4 : vector<1x96xf32> to vector<8x96xf32>
    %6 = arith.addf %3, %5 : vector<8x96xf32>
    %7 = vector.extract_strided_slice %6 {offsets = [0, 0], sizes = [8, 32], strides = [1, 1]} : vector<8x96xf32> to vector<8x32xf32>
    %8 = vector.shape_cast %7 : vector<8x32xf32> to vector<8x4x8xf32>
    %9 = tpu.transpose %8, [1, 0, 2] : vector<8x4x8xf32> -> vector<4x8x8xf32>
    %10 = vector.extract_strided_slice %6 {offsets = [0, 32], sizes = [8, 32], strides = [1, 1]} : vector<8x96xf32> to vector<8x32xf32>
    %11 = vector.shape_cast %10 : vector<8x32xf32> to vector<8x4x8xf32>
    %12 = tpu.transpose %11, [1, 0, 2] : vector<8x4x8xf32> -> vector<4x8x8xf32>
    %13 = vector.extract_strided_slice %6 {offsets = [0, 64], sizes = [8, 32], strides = [1, 1]} : vector<8x96xf32> to vector<8x32xf32>
    %14 = vector.shape_cast %13 : vector<8x32xf32> to vector<8x4x8xf32>
    %15 = tpu.transpose %14, [1, 0, 2] : vector<8x4x8xf32> -> vector<4x8x8xf32>
    "tpu.trace_start"() <{level = 10 : i32, message = "htd,hsd->hts"}> : () -> ()
    %cst_6 = arith.constant dense<0.000000e+00> : vector<4x8x8xf32>
    %16 = tpu.matmul %9, %12, %cst_6 {dimension_numbers = #tpu.dot_dimension_numbers<[2], [2], [1], [1], [0, 0, 0, 1, 1, 1], [0], [0]>} : vector<4x8x8xf32>, vector<4x8x8xf32>, vector<4x8x8xf32> -> vector<4x8x8xf32>
    "tpu.trace_stop"() : () -> ()
    %17 = tpu.iota {dimensions = array<i32: 0>} : vector<8x8xi32>
    %18 = tpu.iota {dimensions = array<i32: 1>} : vector<8x8xi32>
    %19 = arith.cmpi sgt, %18, %17 : vector<8x8xi32>
    %20 = vector.shape_cast %19 : vector<8x8xi1> to vector<1x8x8xi1>
    %cst_7 = arith.constant -1.000000e+30 : f32
    %21 = vector.shape_cast %20 : vector<1x8x8xi1> to vector<1x8x8xi1>
    %22 = vector.broadcast %21 : vector<1x8x8xi1> to vector<4x8x8xi1>
    %23 = vector.broadcast %cst_7 : f32 to vector<4x8x8xf32>
    %24 = arith.select %22, %23, %16 : vector<4x8x8xi1>, vector<4x8x8xf32>
    %cst_8 = arith.constant dense<0xFF800000> : vector<4x8xf32>
    %25 = vector.multi_reduction <maximumf>, %24, %cst_8 [2] : vector<4x8x8xf32> to vector<4x8xf32>
    %26 = vector.shape_cast %25 : vector<4x8xf32> to vector<4x8x1xf32>
    %27 = vector.broadcast %26 : vector<4x8x1xf32> to vector<4x8x8xf32>
    %28 = arith.subf %24, %27 : vector<4x8x8xf32>
    %29 = math.exp %28 : vector<4x8x8xf32>
    %cst_9 = arith.constant dense<0.000000e+00> : vector<4x8xf32>
    %30 = vector.multi_reduction <add>, %29, %cst_9 [2] : vector<4x8x8xf32> to vector<4x8xf32>
    %31 = vector.shape_cast %30 : vector<4x8xf32> to vector<4x8x1xf32>
    "tpu.trace_start"() <{level = 10 : i32, message = "hts,hsd->htd"}> : () -> ()
    %cst_10 = arith.constant dense<0.000000e+00> : vector<4x8x8xf32>
    %32 = tpu.matmul %29, %15, %cst_10 {dimension_numbers = #tpu.dot_dimension_numbers<[2], [1], [1], [2], [0, 0, 0, 1, 1, 2], [0], [0]>} : vector<4x8x8xf32>, vector<4x8x8xf32>, vector<4x8x8xf32> -> vector<4x8x8xf32>
    "tpu.trace_stop"() : () -> ()
    %33 = tpu.reciprocal %31 {approx = true} : vector<4x8x1xf32> -> vector<4x8x1xf32>
    %34 = vector.broadcast %33 : vector<4x8x1xf32> to vector<4x8x8xf32>
    %35 = arith.mulf %32, %34 : vector<4x8x8xf32>
    %36 = tpu.transpose %35, [1, 0, 2] : vector<4x8x8xf32> -> vector<8x4x8xf32>
    %37 = vector.shape_cast %36 : vector<8x4x8xf32> to vector<8x32xf32>
    %c0_11 = arith.constant 0 : index
    %c0_12 = arith.constant 0 : index
    %38 = vector.load %arg4[%c0_11, %c0_12] : memref<32x32xf32, #tpu.memory_space<vmem>>, vector<32x32xf32>
    %cst_13 = arith.constant dense<0.000000e+00> : vector<8x32xf32>
    %39 = tpu.matmul %37, %38, %cst_13 {dimension_numbers = #tpu.dot_dimension_numbers<[1], [0], [0], [1], [0, 0, 1, 1], [], []>} : vector<8x32xf32>, vector<32x32xf32>, vector<8x32xf32> -> vector<8x32xf32>
    %c0_14 = arith.constant 0 : index
    %c0_15 = arith.constant 0 : index
    %40 = vector.load %arg5[%c0_14, %c0_15] : memref<1x32xf32, #tpu.memory_space<vmem>>, vector<1x32xf32>
    %41 = vector.broadcast %40 : vector<1x32xf32> to vector<8x32xf32>
    %42 = arith.addf %39, %41 : vector<8x32xf32>
    %c0_16 = arith.constant 0 : index
    %c0_17 = arith.constant 0 : index
    %c0_18 = arith.constant 0 : index
    %43 = vector.load %arg6[%c0_16, %c0_17, %c0_18] : memref<1x8x32xf32, #tpu.memory_space<vmem>>, vector<1x8x32xf32>
    %44 = vector.shape_cast %43 : vector<1x8x32xf32> to vector<8x32xf32>
    %45 = vector.shape_cast %42 : vector<8x32xf32> to vector<1x8x32xf32>
    tpu.vector_store %arg6[%c0_16, %c0_17, %c0_18], %45 {strides = array<i32>} : memref<1x8x32xf32, #tpu.memory_space<vmem>>, vector<1x8x32xf32>,
    return
  }
  func.func @transform_0(%arg0: i32) -> (i32, i32, i32) {
    %c0_i32 = arith.constant 0 : i32
    %c0_i32_0 = arith.constant 0 : i32
    %c0_i32_1 = arith.constant 0 : i32
    return %arg0, %c0_i32, %c0_i32_0 : i32, i32, i32
  }
  func.func @transform_1(%arg0: i32) -> (i32, i32) {
    %c0_i32 = arith.constant 0 : i32
    %c0_i32_0 = arith.constant 0 : i32
    %c0_i32_1 = arith.constant 0 : i32
    return %c0_i32, %c0_i32_0 : i32, i32
  }
  func.func @transform_2(%arg0: i32) -> (i32, i32) {
    %c0_i32 = arith.constant 0 : i32
    %c0_i32_0 = arith.constant 0 : i32
    %c0_i32_1 = arith.constant 0 : i32
    return %c0_i32, %c0_i32_0 : i32, i32
  }
  func.func @transform_3(%arg0: i32) -> (i32, i32) {
    %c0_i32 = arith.constant 0 : i32
    %c0_i32_0 = arith.constant 0 : i32
    %c0_i32_1 = arith.constant 0 : i32
    return %c0_i32, %c0_i32_0 : i32, i32
  }
  func.func @transform_4(%arg0: i32) -> (i32, i32) {
    %c0_i32 = arith.constant 0 : i32
    %c0_i32_0 = arith.constant 0 : i32
    %c0_i32_1 = arith.constant 0 : i32
    return %c0_i32, %c0_i32_0 : i32, i32
  }
  func.func @transform_5(%arg0: i32) -> (i32, i32, i32) {
    %c0_i32 = arith.constant 0 : i32
    %c0_i32_0 = arith.constant 0 : i32
    %c0_i32_1 = arith.constant 0 : i32
    return %arg0, %c0_i32, %c0_i32_0 : i32, i32, i32
  }
}

</mosaic_0001>

<bundles_post_ra>
// kernel: tpu_custom_call.1
= control target key start
LH: loop header
LB: loop body
LE: loop exit
PB: predicated region body
PF: predicated region fallthrough
CT: control target
= control target key end

     0   :  { %10 = vsyncpa [#allocation3], 0  ;;  %s2629_s0 = inlined_call_operand.hbm [shape: f32[2,8,32], index: 0, kind: input, shape index: {}]   ;;  %s2630_s1 = inlined_call_operand.hbm [shape: f32[32,96], index: 1, kind: input, shape index: {}]   ;;  %s2631_s2 = inlined_call_operand.vmem [shape: f32[1,96], index: 2, kind: input, shape index: {}]   ;;  %s2632_s3 = inlined_call_operand.hbm [shape: f32[32,32], index: 3, kind: input, shape index: {}]   ;;  %s2633_s4 = inlined_call_operand.vmem [shape: f32[1,32], index: 4, kind: input, shape index: {}]   ;;  %s2634_s5 = inlined_call_operand.hbm [shape: f32[2,8,32], index: 5, kind: output, shape index: {}]  }
   0x1   :  { %12 = vsyncpa [#allocation3 + $0x1], 0 }
   0x2   :  { %13 = vsyncpa [#allocation6], 0 }
   0x3   :  { %14 = vsyncpa [#allocation4], 0 }
   0x4   :  { %16 = vsyncpa [#allocation4 + $0x1], 0  ;;  %s2235_s18 = smov 0   ;;  %s2237_s19 = smov 0  }
   0x5   :  { %s2239_s20 = smov 0   ;;  %s2241_s21 = smov 0  }
   0x6 LB: > { %s2256_s22 = sadd.s32 4294967295, %s2184_s21   ;;  %s1790_s23 = sadd.s32 4294967294, %s2184_s21   ;;  %s2184_s21 = sphi %s2241_s21, %s2654_s21   ;;  %s2180_s20 = sphi %s2239_s20, %s2653_s20   ;;  %s2176_s19 = sphi %s2237_s19, %s2652_s19   ;;  %s2172_s18 = sphi %s2235_s18, %s2651_s18  }
   0x7   : > { %p42_p0 = scmp.ne.s32.totalorder %s2176_s19, %s2172_s18  ;;  %p2635_p1 = scmp.eq.s32.totalorder %s2256_s22, 0 }
   0x8   : > { %p156_p3 = scmp.eq.s32.totalorder %s1790_s23, 1  ;;  %p1791_p5 = scmp.ge.s32.totalorder %s2184_s21, 1 }
   0x9   : > { %p2265_p4 = por %p2635_p1, %p42_p0  ;;  %p163_p7 = scmp.lt.s32.totalorder %s2184_s21, 3 }
   0xa   : > { %p2270_p6 = por %p156_p3, %p42_p0  ;;  %s2186_s27 = smov [#allocation5]  }
   0xb   : > { %s2638_s24 = scalar_select %p2265_p4, 1, 0 }
   0xc   : > { %s2639_s25 = scalar_select %p2270_p6, 1, 0 }
   0xd   : > { %p2275_p8 = pnand %p1791_p5, %p163_p7  ;;  %s175_s28 = sshll.u32 %s2186_s27, 4  ;;  %s2279_s28 = int_to_ptr.vmem [resolvable:$true] %s175_s28 }
   0xe   : > { %s2187_s30 = smov [#allocation7]   ;;  %s2028_s9 = scalar_lea.hbm %s2630_s1, 512 }
   0xf   : > { %p1942_p9 = pneg %p2275_p8  ;;  %s191_s6 = sshll.u32 %s2187_s30, 4  ;;  %s2290_s6 = int_to_ptr.vmem [resolvable:$true] %s191_s6 }
  0x10   : > { %p2029_p12 = scmp.ne.s32.totalorder %s2630_s1, %s2028_s9  ;;  %p2035_p5 = scmp.lt.u32.totalorder %s2028_s9, %s2630_s1 }
  0x11   : > { %p2286_p11 = pnand %p1942_p9, %p2635_p1 }
  0x13   : > { %p2030_p13 = pneg %p2286_p11 }
  0x15   : > { %p2031_p0 = pnand %p2030_p13, %p2029_p12 }
  0x17   : > { %p2032_p3 = pneg %p2031_p0 }
  0x19   : > { %p2037_p7 = pnand %p2035_p5, %p2032_p3 }
  0x1b   : > { %2040 = shalt.err (!%p2037_p7)
}
  0x1c   : > { %s2041_s14 = scalar_lea.vmem %s2279_s28, 512  ;;  %p2049_p2 = scmp.lt.s32.totalorder %s2279_s28, %s2279_s28 }
  0x1d   : > { %p2042_p9 = scmp.ne.s32.totalorder %s2279_s28, %s2041_s14  ;;  %p2050_p12 = scmp.lt.s32.totalorder %s2041_s14, %s2041_s14 }
  0x1f   : > { %p2044_p10 = pnand %p2042_p9, %p2030_p13  ;;  %p2051_p0 = por %p2050_p12, %p2049_p2 }
  0x21   : > { %p2045_p1 = pneg %p2044_p10 }
  0x23   : > { %p2052_p6 = pnand %p2051_p0, %p2045_p1 }
  0x25   : > { %2055 = shalt.err (!%p2052_p6)
}
  0x26   : > { %s2188_s15 = smov 128   ;;  %s2189_s16 = smov 8  }
  0x27   : > { %1945 = dma.hbm_to_vmem [thread:$0]  (!%p2286_p11), %s2630_s1, 512, %s2279_s28, [#allocation6], %s2188_s15, %s2188_s15, %s2189_s16  }
  0x28   : > { %s2056_s7 = scalar_lea.hbm %s2632_s3, 512 }
  0x29   : > { %p2057_p2 = scmp.ne.s32.totalorder %s2632_s3, %s2056_s7  ;;  %p2063_p10 = scmp.lt.u32.totalorder %s2056_s7, %s2632_s3 }
  0x2b   : > { %p2059_p1 = pnand %p2057_p2, %p2030_p13 }
  0x2d   : > { %p2060_p6 = pneg %p2059_p1 }
  0x2f   : > { %p2065_p3 = pnand %p2063_p10, %p2060_p6 }
  0x31   : > { %2068 = shalt.err (!%p2065_p3)
}
  0x32   : > { %s2069_s28 = scalar_lea.vmem %s2290_s6, 512  ;;  %p2077_p12 = scmp.lt.s32.totalorder %s2290_s6, %s2290_s6 }
  0x33   : > { %p2070_p5 = scmp.ne.s32.totalorder %s2290_s6, %s2069_s28  ;;  %p2078_p0 = scmp.lt.s32.totalorder %s2069_s28, %s2069_s28 }
  0x35   : > { %p2072_p7 = pnand %p2070_p5, %p2030_p13  ;;  %p2079_p2 = por %p2078_p0, %p2077_p12 }
  0x37   : > { %p2073_p9 = pneg %p2072_p7 }
  0x39   : > { %p2080_p1 = pnand %p2079_p2, %p2073_p9 }
  0x3b   : > { %2083 = shalt.err (!%p2080_p1)
}
  0x3c   : > { %1948 = dma.hbm_to_vmem [thread:$0]  (!%p2286_p11), %s2632_s3, 512, %s2290_s6, [#allocation6], %s2188_s15, %s2188_s15, %s2189_s16  }
  0x3d   : > { %s2345_s14 = sadd.s32 1, %s2184_s21   ;;  %s29_s29 = sadd.s32 1, %s2180_s20 }
  0x3e   : > { %s26_s17 = ssub.s32 %s2184_s21, %s2345_s14  ;;  %p36_p13 = scmp.ne.s32.totalorder %s2180_s20, %s2176_s19 }
  0x3f   : > { %p27_p6 = scmp.eq.s32.totalorder %s26_s17, 0  ;;  %p37_p10 = scmp.eq.s32.totalorder %s2184_s21, 0 }
  0x40   : > { %p2642_p3 = scmp.eq.s32.totalorder %s2256_s22, 1  ;;  %p1959_p7 = scmp.lt.s32.totalorder %s2184_s21, 2 }
  0x41   : > { %s2361_s27 = scalar_select %p27_p6, %s2180_s20, %s29_s29  }
  0x42   : > { %p2355_p5 = por %p2642_p3, %p36_p13  ;;  %p38_p9 = por %p37_p10, %p36_p13 }
  0x43   : > { %s208_s30 = sand.u32 1, %s2180_s20   ;;  %s1796_s6 = sshll.u32 %s2184_s21, 7 }
  0x44   : > { %s2643_s23 = scalar_select %p2355_p5, 1, 0 }
  0x45   : > { %s1795_s7 = sshll.u32 %s208_s30, 3  ;;  %s2368_s8 = scalar_lea.hbm %s2629_s0, %s1796_s6 }
  0x46   : > { %s212_s9 = scalar_lea.vmem [#allocation2], %s1795_s7  ;;  %p2372_p11 = pnand %p1959_p7, %p38_p9 }
  0x47   : > { %s219_s10 = sshll.u32 %s212_s9, 4  ;;  %s209_s28 = scalar_lea.sflag [#allocation3], %s208_s30  ;;  %s2370_s10 = int_to_ptr.vmem [resolvable:$true] %s219_s10 }
  0x48   : > { %s2084_s12 = scalar_lea.hbm %s2368_s8, 128  ;;  %p2086_p0 = pneg %p2372_p11 }
  0x49   : > { %p2085_p12 = scmp.ne.s32.totalorder %s2368_s8, %s2084_s12  ;;  %s2089_s17 = scalar_lea.hbm %s2629_s0, 256 }
  0x4a   : > { %p2090_p13 = scmp.lt.u32.totalorder %s2368_s8, %s2629_s0  ;;  %p2091_p6 = scmp.lt.u32.totalorder %s2089_s17, %s2084_s12 }
  0x4b   : > { %p2087_p2 = pnand %p2086_p0, %p2085_p12  ;;  %p2093_p3 = scmp.lt.u32.totalorder %s2084_s12, %s2368_s8 }
  0x4c   : > { %p2092_p10 = por %p2091_p6, %p2090_p13 }
  0x4d   : > { %p2088_p1 = pneg %p2087_p2 }
  0x4e   : > { %p2094_p7 = por %p2093_p3, %p2092_p10 }
  0x50   : > { %p2095_p9 = pnand %p2094_p7, %p2088_p1 }
  0x52   : > { %2098 = shalt.err (!%p2095_p9)
}
  0x53   : > { %s2099_s30 = scalar_lea.vmem %s2370_s10, 128  ;;  %s2190_s15 = smov [#allocation2]  }
  0x54   : > { %p2100_p12 = scmp.ne.s32.totalorder %s2370_s10, %s2099_s30  ;;  %s2104_s16 = sshll.u32 %s2190_s15, 4  ;;  %s2105_s16 = int_to_ptr.vmem [resolvable:$false] %s2104_s16 }
  0x55   : > { %s2106_s9 = scalar_lea.vmem %s2105_s16, 256  ;;  %p2107_p4 = scmp.lt.s32.totalorder %s2370_s10, %s2105_s16 }
  0x56   : > { %p2102_p2 = pnand %p2100_p12, %p2086_p0  ;;  %p2108_p13 = scmp.lt.s32.totalorder %s2106_s9, %s2099_s30 }
  0x58   : > { %p2103_p5 = pneg %p2102_p2  ;;  %p2109_p6 = por %p2108_p13, %p2107_p4 }
  0x5a   : > { %p2110_p10 = pnand %p2109_p6, %p2103_p5 }
  0x5c   : > { %2113 = shalt.err (!%p2110_p10)
}
  0x5d   : > { %1952 = dma.hbm_to_vmem [thread:$0]  (!%p2372_p11), %s2368_s8, 128, %s2370_s10, %s209_s28  }
  0x5e   : > { %228 = sbr.rel (%p2275_p8) target bundleno = 1559 (0x617), region = 40  ;;  %s2404_s12 = sand.u32 (!%p2275_p8), 1, %s2176_s19  }
  0x5f   : > { %s1798_s13 = sshll.u32 (!%p2275_p8), %s2404_s12, 3  ;;  %s231_s29 = scalar_lea.sflag (!%p2275_p8), [#allocation3], %s2404_s12 }
  0x60   : > { %s234_s17 = scalar_lea.vmem (!%p2275_p8), [#allocation2], %s1798_s13  ;;  %p2645_p4 = scmp.ne.s32.totalorder (!%p2275_p8), %s2638_s24, 0 }
  0x65   : > { %2159 = dma.done.wait (%p2645_p4), %s231_s29, 128  }
  0x66   : > { %2161 = vsyncadd (%p2645_p4), %s231_s29, 4294967168  ;;  %p2646_p5 = scmp.eq.s32.totalorder %s2256_s22, 0 }
  0x68   : > { %2163 = dma.done.wait (%p2646_p5), [#allocation6], 1024   ;;  %p2647_p8 = pmov %p2646_p5 }
  0x69   : > { %v2191_v0 = vmov 0.0|0.0   ;;  %vm2192_vm0 = vmmov 0   ;;  %v2193_v1 = vmov 0.0   ;;  %v270_v2 = vld [vmem:[#allocation5] sm:$0xff]  ;;  %v271_v3 = vld [vmem:[#allocation5 + $0x8] sm:$0xff]  ;;  %v272_v4 = vld [vmem:[#allocation5 + $0x10] sm:$0xff]  ;;  %v370_v18 = vlaneseq }
  0x6a   : > { %2165 = vsyncadd (%p2647_p8), [#allocation6], 4294966272  ;;  %1918 = vmatprep.subr.bf16.mxu0 %v2191_v0  ;;  %1864 = vmatprep.mubr.msk.f32.mxu0 %vm2192_vm0, %v2193_v1  ;;  %v1919_v5 = vpack.c.bf16 %v271_v3, %v270_v2  ;;  %v273_v6 = vld [vmem:[#allocation5 + $0x18] sm:$0xff]  ;;  %vm281_vm1 = vcmask 261120   ;;  %v1802_v9 = vld [vmem:[%s2631_s2] ss:$0 sm:$0xff] }
  0x6b   : > { %1867 = vmatprep.subr.mxu1 %v2193_v1  ;;  %1869 = vmatprep.mubr.msk.f32.mxu1 %vm2192_vm0, %v2193_v1  ;;  %v1922_v7 = vpack.c.bf16 %v273_v6, %v272_v4  ;;  %v269_v8 = vld [vmem:[%s234_s17] sm:$0xff]  ;;  %s2194_s8 = smov 104   ;;  %s2195_s10 = smov 120   ;;  %v2199_v16 = vmov 1983009808   ;;  %v2441_v20 = vshrl.u32 %v370_v18, 7 }
  0x6c   : > { %1920 = vmatpush3.bf16.msra.mxu0 %v1919_v5  ;;  %s2196_s11 = smov 96   ;;  %s2197_s28 = smov 112   ;;  %v368_v17 = vunpack.c.l.s4 %v2199_v16  ;;  %v2200_v21 = vmov 1934713408   ;;  %vm797_vm2 = vcmask 64512   ;;  %vm1598_vm4 = vcmask 130048  }
  0x6d   : > { %1921 = vmatprep.subr.bf16.mxu0 %v2191_v0  ;;  %s2198_s7 = smov 64   ;;  %v400_v22 = vunpack.c.l.s4 %v2200_v21  ;;  %s2201_s6 = smov 16   ;;  %vm1600_vm5 = vcmask 195584  }
  0x6e   : > { %v369_v19 = vunpack.c.0.s8 %v368_v17  ;;  %s2202_s30 = smov 8   ;;  %s2203_s15 = smov 24  }
  0x6f   : > { %v401_v28 = vunpack.c.0.s8 %v400_v22  ;;  %s1827_s29 = sshll.u32 %s2256_s22, 7  ;;  %s268_s17 = scalar_lea.vmem [#allocation8], %s1798_s13 }
  0x70   : > { %1923 = vmatpush3.bf16.msra.mxu0 %v1922_v7  ;;  %v2446_v25 = vsub.s32 %v369_v19, %v2441_v20  ;;  %s1701_s24 = sshll.u32 %s268_s17, 4  ;;  %p2648_p0 = scmp.ne.s32.totalorder %s2643_s23, 0  ;;  %s2586_s24 = int_to_ptr.vmem [resolvable:$true] %s1701_s24 }
  0x71   : > { %1887 = vmatprep.subr.mxu0 %v2193_v1  ;;  %v2455_v33 = vsub.s32 %v401_v28, %v2441_v20  ;;  %s2114_s22 = scalar_lea.vmem %s2586_s24, 128  ;;  %s2204_s13 = smov [#allocation8]  }
  0x72   : > { %p2115_p11 = scmp.ne.s32.totalorder %s2586_s24, %s2114_s22 }
  0x73   : > { %1865 = vmatmul.mubr.msk.f32.vlgmr.msra.gmra.mrb[0].mxu0 %vm281_vm1, %v269_v8 }
  0x74   : > { %1889 = vmatprep.mubr.msk.f32.mxu0 %vm2192_vm0, %v2193_v1  ;;  %p2116_p1 = pnand %p2115_p11, %p2648_p0 }
  0x76   : > { %p2117_p3 = pneg %p2116_p1 }
 0x146   : > { %v351_v10 = vpop.f32.mrb[0].mxu0 }
 0x147   : > { %v352_v11 = vadd.f32 %v1802_v9, %v351_v10  ;;  %v1866_v12 = vpop.f32.mrb[1].mxu0 }
 0x149   : > { %362 = vrot.lane.b32.xlu1 %v352_v11, %s2194_s8  ;;  %356 = vrot.lane.b32.xlu0 %v352_v11, %s2195_s10  ;;  %s2584_s10 = scalar_lea.hbm %s2634_s5, %s1827_s29 }
 0x14d   : > { %501 = vrot.lane.b32.xlu1 %v352_v11, %s2196_s11  ;;  %359 = vrot.lane.b32.xlu0 %v352_v11, %s2197_s28  ;;  %s2118_s28 = sshll.u32 %s2204_s13, 4  ;;  %s2119_s28 = int_to_ptr.vmem [resolvable:$false] %s2118_s28 }
 0x14e   : > { %p2121_p7 = scmp.lt.s32.totalorder %s2586_s24, %s2119_s28 }
 0x1bb   : > { %v357_v13 = vpop.permute.xlu0 %356  ;;  %v2432_v14 = vpop.permute.xlu1 %362 }
 0x1bc   : > { %503 = vrot.lane.b32.xlu0 %v357_v13, %s2196_s11  ;;  %v381_v26 = vcombine.low %v357_v13, %v2432_v14  ;;  %v382_v27 = vcombine.high %v357_v13, %v2432_v14 }
 0x1be   : > { %v389_v31 = vrot.slane %v381_v26, %v2446_v25  ;;  %v396_v32 = vrot.slane %v382_v27, %v2446_v25 }
 0x1bf   : > { %v2434_v15 = vpop.permute.xlu0 %359  ;;  %v502_v34 = vpop.permute.xlu1 %501 }
 0x1c0   : > { %507 = vrot.lane.b32.xlu0 %v2432_v14, %s2196_s11  ;;  %505 = vrot.lane.b32.xlu1 %v2434_v15, %s2196_s11  ;;  %v365_v23 = vcombine.low %v352_v11, %v2434_v15  ;;  %v366_v24 = vcombine.high %v352_v11, %v2434_v15  ;;  %s1688_s11 = scalar_lea.sflag [#allocation4], %s2404_s12 }
 0x1c2   : > { %v373_v29 = vrot.slane %v365_v23, %v2446_v25  ;;  %v380_v30 = vrot.slane %v366_v24, %v2446_v25 }
 0x1c4   : > { %649 = vrot.lane.b32.xlu0 %v352_v11, %s2198_s7  ;;  %651 = vrot.lane.b32.xlu1 %v357_v13, %s2198_s7  ;;  %v397_v35 = vcombine.low %v373_v29, %v389_v31  ;;  %v398_v36 = vcombine.high %v373_v29, %v389_v31  ;;  %v413_v37 = vcombine.low %v380_v30, %v396_v32 }
 0x1c5   : > { %v414_v38 = vcombine.high %v380_v30, %v396_v32 }
 0x1c6   : > { %v405_v40 = vrot.slane %v397_v35, %v2455_v33  ;;  %v412_v41 = vrot.slane %v398_v36, %v2455_v33  ;;  %v421_v42 = vrot.slane %v413_v37, %v2455_v33 }
 0x1c7   : > { %v428_v43 = vrot.slane %v414_v38, %v2455_v33 }
 0x1c8   : > { %v433_v54 = vcombine.low %v405_v40, %v412_v41  ;;  %v1804_v55 = vcombine.high %v405_v40, %v412_v41 }
 0x1c9   : > { %v449_v56 = vcombine.low %v421_v42, %v428_v43  ;;  %v1805_v57 = vcombine.high %v421_v42, %v428_v43 }
 0x1ca   : > { %v440_v4 = vrot.slane %v433_v54, %v2446_v25  ;;  %v448_v5 = vrot.slane %v1804_v55, %v2446_v25 }
 0x1cb   : > { %v456_v6 = vrot.slane %v449_v56, %v2446_v25  ;;  %v464_v7 = vrot.slane %v1805_v57, %v2446_v25 }
 0x1cc   : > { %v465_v19 = vcombine.low %v440_v4, %v448_v5  ;;  %v466_v32 = vcombine.high %v440_v4, %v448_v5 }
 0x1cd   : > { %v481_v21 = vcombine.low %v456_v6, %v464_v7 }
 0x1ce   : > { %v473_v27 = vrot.slane %v465_v19, %v2455_v33  ;;  %v480_v40 = vrot.slane %v466_v32, %v2455_v33 }
 0x1cf   : > { %v489_v28 = vrot.slane %v481_v21, %v2455_v33 }
 0x1d1   : > { %v497_v35 = vcombine.low %v473_v27, %v489_v28 }
 0x22e   : > { %v504_v39 = vpop.permute.xlu0 %503 }
 0x232   : > { %v506_v44 = vpop.permute.xlu1 %505  ;;  %v508_v45 = vpop.permute.xlu0 %507 }
 0x233   : > { %v513_v46 = vcombine.low %v502_v34, %v506_v44  ;;  %v514_v47 = vcombine.high %v502_v34, %v506_v44  ;;  %v529_v48 = vcombine.low %v504_v39, %v508_v45  ;;  %v530_v49 = vcombine.high %v504_v39, %v508_v45 }
 0x234   : > { %v482_v34 = vcombine.high %v456_v6, %v464_v7  ;;  %v498_v39 = vcombine.high %v473_v27, %v489_v28 }
 0x235   : > { %v521_v50 = vrot.slane %v513_v46, %v2446_v25  ;;  %v528_v51 = vrot.slane %v514_v47, %v2446_v25  ;;  %v537_v52 = vrot.slane %v529_v48, %v2446_v25  ;;  %v544_v53 = vrot.slane %v530_v49, %v2446_v25 }
 0x236   : > { %v496_v41 = vrot.slane %v482_v34, %v2455_v33  ;;  %v1105_v46 = vand.u32 127, %v370_v18 }
 0x237   : > { %v545_v58 = vcombine.low %v521_v50, %v537_v52  ;;  %v546_v59 = vcombine.high %v521_v50, %v537_v52  ;;  %v561_v60 = vcombine.low %v528_v51, %v544_v53  ;;  %v562_v61 = vcombine.high %v528_v51, %v544_v53 }
 0x238   : > { %v499_v43 = vcombine.low %v480_v40, %v496_v41  ;;  %v500_v45 = vcombine.high %v480_v40, %v496_v41  ;;  %vm1106_vm3 = vcmp.gt.s32.totalorder %v1105_v46, %v2441_v20 }
 0x239   : > { %v553_v62 = vrot.slane %v545_v58, %v2455_v33  ;;  %v560_v63 = vrot.slane %v546_v59, %v2455_v33  ;;  %v569_v2 = vrot.slane %v561_v60, %v2455_v33  ;;  %v576_v3 = vrot.slane %v562_v61, %v2455_v33 }
 0x23b   : > { %v581_v8 = vcombine.low %v553_v62, %v560_v63  ;;  %v1806_v9 = vcombine.high %v553_v62, %v560_v63  ;;  %v597_v10 = vcombine.low %v569_v2, %v576_v3  ;;  %v1807_v11 = vcombine.high %v569_v2, %v576_v3  ;;  %v652_v62 = vpop.permute.xlu1 %651  ;;  %v650_v63 = vpop.permute.xlu0 %649 }
 0x23d   : > { %v588_v12 = vrot.slane %v581_v8, %v2446_v25  ;;  %v596_v13 = vrot.slane %v1806_v9, %v2446_v25  ;;  %v604_v16 = vrot.slane %v597_v10, %v2446_v25  ;;  %v612_v17 = vrot.slane %v1807_v11, %v2446_v25 }
 0x23f   : > { %v613_v22 = vcombine.low %v588_v12, %v596_v13  ;;  %v629_v23 = vcombine.low %v604_v16, %v612_v17  ;;  %v614_v29 = vcombine.high %v588_v12, %v596_v13  ;;  %v630_v30 = vcombine.high %v604_v16, %v612_v17 }
 0x241   : > { %v621_v24 = vrot.slane %v613_v22, %v2455_v33  ;;  %v637_v26 = vrot.slane %v629_v23, %v2455_v33  ;;  %v628_v37 = vrot.slane %v614_v29, %v2455_v33  ;;  %v644_v38 = vrot.slane %v630_v30, %v2455_v33 }
 0x243   : > { %v645_v31 = vcombine.low %v621_v24, %v637_v26  ;;  %v646_v36 = vcombine.high %v621_v24, %v637_v26  ;;  %v647_v42 = vcombine.low %v628_v37, %v644_v38  ;;  %v648_v44 = vcombine.high %v628_v37, %v644_v38 }
 0x245   : > { %1868 = vmatpush3.xpose.msk.msra.mxu1 %vm797_vm2, %v645_v31 }
 0x246   : > { %1872 = vmatprep.subr.mxu1 %v2193_v1 }
 0x248   : > { %1870 = vmatmul.mubr.msk.f32.vlgmr.msra.gmra.mrb[0].mxu1 %vm797_vm2, %v497_v35 }
 0x249   : > { %1873 = vmatpush3.xpose.msk.msra.mxu1 %vm797_vm2, %v646_v36  ;;  %1874 = vmatprep.mubr.msk.f32.mxu1 %vm2192_vm0, %v2193_v1 }
 0x24a   : > { %1877 = vmatprep.subr.mxu1 %v2193_v1 }
 0x24c   : > { %1875 = vmatmul.mubr.msk.f32.vlgmr.msra.gmra.mrb[2].mxu1 %vm797_vm2, %v498_v39 }
 0x24d   : > { %1878 = vmatpush3.xpose.msk.msra.mxu1 %vm797_vm2, %v647_v42  ;;  %1879 = vmatprep.mubr.msk.f32.mxu1 %vm2192_vm0, %v2193_v1 }
 0x24e   : > { %1882 = vmatprep.subr.mxu1 %v2193_v1 }
 0x250   : > { %1880 = vmatmul.mubr.msk.f32.vlgmr.msra.gmra.mrb[4].mxu1 %vm797_vm2, %v499_v43 }
 0x251   : > { %1883 = vmatpush3.xpose.msk.msra.mxu1 %vm797_vm2, %v648_v44  ;;  %1884 = vmatprep.mubr.msk.f32.mxu1 %vm2192_vm0, %v2193_v1 }
 0x252   : > { %1892 = vmatprep.subr.mxu1 %v2193_v1 }
 0x254   : > { %1885 = vmatmul.mubr.msk.f32.vlgmr.msra.gmra.mrb[6].mxu1 %vm797_vm2, %v500_v45 }
 0x255   : > { %1894 = vmatprep.mubr.msk.f32.mxu1 %vm2192_vm0, %v2193_v1 }
 0x31b   : > { %v870_v47 = vpop.f32.mrb[0].mxu1 }
 0x31c   : > { %v1109_v48 = vsel %vm1106_vm3, -1e+30, %v870_v47  ;;  %v1871_v49 = vpop.f32.mrb[1].mxu1 }
 0x31d   : > { %v1113_v50 = vsel %vm797_vm2, %v1109_v48, -inf }
 0x31e   : > { %1114 = vmax.xlane.f32.xlu1 %v1113_v50 }
 0x31f   : > { %v946_v51 = vpop.f32.mrb[2].mxu1 }
 0x320   : > { %v1110_v52 = vsel %vm1106_vm3, -1e+30, %v946_v51  ;;  %v1876_v53 = vpop.f32.mrb[3].mxu1 }
 0x321   : > { %v1116_v54 = vsel %vm797_vm2, %v1110_v52, -inf }
 0x322   : > { %1117 = vmax.xlane.f32.xlu0 %v1116_v54 }
 0x323   : > { %v1022_v55 = vpop.f32.mrb[4].mxu1 }
 0x324   : > { %v1111_v18 = vsel %vm1106_vm3, -1e+30, %v1022_v55  ;;  %v1881_v56 = vpop.f32.mrb[5].mxu1 }
 0x325   : > { %v1119_v57 = vsel %vm797_vm2, %v1111_v18, -inf }
 0x326   : > { %1120 = vmax.xlane.f32.xlu0 %v1119_v57 }
 0x327   : > { %v1098_v58 = vpop.f32.mrb[6].mxu1 }
 0x328   : > { %v1112_v59 = vsel %vm1106_vm3, -1e+30, %v1098_v58  ;;  %v1886_v60 = vpop.f32.mrb[7].mxu1 }
 0x329   : > { %v1122_v61 = vsel %vm797_vm2, %v1112_v59, -inf }
 0x32a   : > { %1123 = vmax.xlane.f32.xlu1 %v1122_v61 }
 0x33b   : > { %653 = vrot.lane.b32.xlu1 %v2434_v15, %s2198_s7 }
 0x33c   : > { %655 = vrot.lane.b32.xlu0 %v2432_v14, %s2198_s7  ;;  %s2120_s7 = scalar_lea.vmem %s2119_s28, 256 }
 0x33d   : > { %p2122_p9 = scmp.lt.s32.totalorder %s2120_s7, %s2114_s22 }
 0x33f   : > { %p2123_p12 = por %p2122_p9, %p2121_p7 }
 0x341   : > { %p2124_p2 = pnand %p2123_p12, %p2117_p3 }
 0x3ab   : > { %v1115_v2 = vpop.xlane.xlu1 %1114 }
 0x3ac   : > { %v1125_v3 = vsub.f32 %v1109_v48, %v1115_v2 }
 0x3ae   : > { %v1129_v4 = vmul.f32 1.442695, %v1125_v3 }
 0x3af   : > { %v1118_v5 = vpop.xlane.xlu0 %1117 }
 0x3b0   : > { %2012 = vpow2.f32 %v1129_v4  ;;  %v1126_v6 = vsub.f32 %v1110_v52, %v1118_v5 }
 0x3b2   : > { %v1131_v20 = vmul.f32 1.442695, %v1126_v6 }
 0x3b3   : > { %v1121_v7 = vpop.xlane.xlu0 %1120 }
 0x3b4   : > { %2014 = vpow2.f32 %v1131_v20  ;;  %v1127_v8 = vsub.f32 %v1111_v18, %v1121_v7 }
 0x3b6   : > { %v1133_v9 = vmul.f32 1.442695, %v1127_v8 }
 0x3b7   : > { %v1124_v10 = vpop.xlane.xlu1 %1123  ;;  %v656_v11 = vpop.permute.xlu0 %655 }
 0x3b8   : > { %2016 = vpow2.f32 %v1133_v9  ;;  %v1128_v15 = vsub.f32 %v1112_v59, %v1124_v10  ;;  %v677_v14 = vcombine.low %v652_v62, %v656_v11  ;;  %v678_v16 = vcombine.high %v652_v62, %v656_v11  ;;  %v1602_v62 = vld [vmem:[#allocation7] sm:$0xff] }
 0x3ba   : > { %v2013_v12 = vpop.eup %2012  ;;  %v1135_v13 = vmul.f32 1.442695, %v1128_v15  ;;  %v685_v24 = vrot.slane %v677_v14, %v2446_v25  ;;  %v692_v26 = vrot.slane %v678_v16, %v2446_v25 }
 0x3bb   : > { %v654_v17 = vpop.permute.xlu1 %653  ;;  %v1137_v19 = vsel %vm797_vm2, %v2013_v12, 0.0 }
 0x3bc   : > { %2018 = vpow2.f32 %v1135_v13  ;;  %v661_v21 = vcombine.low %v650_v63, %v654_v17  ;;  %v662_v22 = vcombine.high %v650_v63, %v654_v17  ;;  %1138 = vadd.xlane.f32.xlu1 %v1137_v19  ;;  %v1603_v63 = vld [vmem:[#allocation7 + $0x8] sm:$0xff] }
 0x3bd   : > { %v1925_v2 = vpack.c.bf16 %v1603_v63, %v1602_v62 }
 0x3be   : > { %v2015_v23 = vpop.eup %2014  ;;  %v669_v27 = vrot.slane %v661_v21, %v2446_v25  ;;  %v676_v28 = vrot.slane %v662_v22, %v2446_v25 }
 0x3bf   : > { %v1140_v29 = vsel %vm797_vm2, %v2015_v23, 0.0 }
 0x3c0   : > { %v693_v30 = vcombine.low %v669_v27, %v685_v24  ;;  %v694_v31 = vcombine.high %v669_v27, %v685_v24  ;;  %v709_v32 = vcombine.low %v676_v28, %v692_v26  ;;  %v710_v34 = vcombine.high %v676_v28, %v692_v26  ;;  %1141 = vadd.xlane.f32.xlu0 %v1140_v29 }
 0x3c2   : > { %v2017_v35 = vpop.eup %2016  ;;  %v701_v36 = vrot.slane %v693_v30, %v2455_v33  ;;  %v708_v37 = vrot.slane %v694_v31, %v2455_v33  ;;  %v717_v38 = vrot.slane %v709_v32, %v2455_v33  ;;  %v724_v39 = vrot.slane %v710_v34, %v2455_v33 }
 0x3c3   : > { %v1143_v40 = vsel %vm797_vm2, %v2017_v35, 0.0 }
 0x3c4   : > { %v729_v41 = vcombine.low %v701_v36, %v708_v37  ;;  %v1808_v42 = vcombine.high %v701_v36, %v708_v37  ;;  %v745_v43 = vcombine.low %v717_v38, %v724_v39  ;;  %v1809_v44 = vcombine.high %v717_v38, %v724_v39  ;;  %1144 = vadd.xlane.f32.xlu0 %v1143_v40  ;;  %v1604_v36 = vld [vmem:[#allocation7 + $0x10] sm:$0xff]  ;;  %v1605_v37 = vld [vmem:[#allocation7 + $0x18] sm:$0xff] }
 0x3c6   : > { %v2019_v45 = vpop.eup %2018  ;;  %v736_v46 = vrot.slane %v729_v41, %v2446_v25  ;;  %v744_v47 = vrot.slane %v1808_v42, %v2446_v25  ;;  %v752_v48 = vrot.slane %v745_v43, %v2446_v25  ;;  %v760_v49 = vrot.slane %v1809_v44, %v2446_v25 }
 0x3c7   : > { %v1146_v50 = vsel %vm797_vm2, %v2019_v45, 0.0  ;;  %v1928_v42 = vpack.c.bf16 %v1605_v37, %v1604_v36 }
 0x3c8   : > { %1147 = vadd.xlane.f32.xlu1 %v1146_v50  ;;  %v761_v51 = vcombine.low %v736_v46, %v744_v47  ;;  %v777_v52 = vcombine.low %v752_v48, %v760_v49  ;;  %v762_v53 = vcombine.high %v736_v46, %v744_v47  ;;  %v778_v54 = vcombine.high %v752_v48, %v760_v49 }
 0x3ca   : > { %v769_v55 = vrot.slane %v761_v51, %v2455_v33  ;;  %v785_v18 = vrot.slane %v777_v52, %v2455_v33  ;;  %v776_v56 = vrot.slane %v762_v53, %v2455_v33  ;;  %v792_v57 = vrot.slane %v778_v54, %v2455_v33 }
 0x3cc   : > { %v793_v58 = vcombine.low %v769_v55, %v785_v18  ;;  %v794_v59 = vcombine.high %v769_v55, %v785_v18  ;;  %v795_v60 = vcombine.low %v776_v56, %v792_v57  ;;  %v796_v61 = vcombine.high %v776_v56, %v792_v57 }
 0x3ce   : > { %1888 = vmatpush3.msra.mxu0 %v793_v58  ;;  %1893 = vmatpush3.msra.mxu1 %v794_v59 }
 0x3cf   : > { %1890 = vmatmul.mubr.msk.f32.vlgmr.msra.gmra.mrb[2].mxu0 %vm797_vm2, %v2013_v12  ;;  %1895 = vmatmul.mubr.msk.f32.vlgmr.msra.gmra.mrb[8].mxu1 %vm797_vm2, %v2015_v23 }
 0x3d0   : > { %1897 = vmatprep.subr.mxu0 %v2193_v1  ;;  %1902 = vmatprep.subr.mxu1 %v2193_v1 }
 0x3d1   : > { %1898 = vmatpush3.msra.mxu0 %v795_v60  ;;  %1903 = vmatpush3.msra.mxu1 %v796_v61 }
 0x3d2   : > { %1899 = vmatprep.mubr.msk.f32.mxu0 %vm2192_vm0, %v2193_v1  ;;  %1904 = vmatprep.mubr.msk.f32.mxu1 %vm2192_vm0, %v2193_v1 }
 0x3d3   : > { %1900 = vmatmul.mubr.msk.f32.vlgmr.msra.gmra.mrb[4].mxu0 %vm797_vm2, %v2017_v35  ;;  %1905 = vmatmul.mubr.msk.f32.vlgmr.msra.gmra.mrb[10].mxu1 %vm797_vm2, %v2019_v45 }
 0x3d4   : > { %1924 = vmatprep.subr.bf16.mxu0 %v2191_v0  ;;  %1915 = vmatprep.mubr.msk.f32.mxu0 %vm2192_vm0, %v2193_v1 }
 0x3d5   : > { %1926 = vmatpush3.bf16.msra.mxu0 %v1925_v2 }
 0x3d6   : > { %1927 = vmatprep.subr.bf16.mxu0 %v2191_v0 }
 0x3d9   : > { %1929 = vmatpush3.bf16.msra.mxu0 %v1928_v42 }
 0x449   : > { %v1139_v4 = vpop.xlane.xlu1 %1138 }
 0x44a   : > { %2020 = vrcp.f32 %v1139_v4  ;;  %v1824_v4 = vld [vmem:[%s2633_s4] ss:$0 sm:$0xff] }
 0x44d   : > { %v1142_v3 = vpop.xlane.xlu0 %1141 }
 0x44e   : > { %2022 = vrcp.f32 %v1142_v3 }
 0x451   : > { %v1145_v5 = vpop.xlane.xlu0 %1144 }
 0x452   : > { %2024 = vrcp.f32 %v1145_v5 }
 0x454   : > { %v2021_v8 = vpop.eup %2020 }
 0x455   : > { %v1148_v6 = vpop.xlane.xlu1 %1147 }
 0x456   : > { %2026 = vrcp.f32 %v1148_v6 }
 0x458   : > { %v2023_v1 = vpop.eup %2022 }
 0x45c   : > { %v2025_v11 = vpop.eup %2024 }
 0x460   : > { %v2027_v15 = vpop.eup %2026 }
 0x4a2   : > { %v1218_v20 = vpop.f32.mrb[2].mxu0  ;;  %v1291_v7 = vpop.f32.mrb[8].mxu1 }
 0x4a3   : > { %v1891_v9 = vpop.f32.mrb[3].mxu0  ;;  %v1896_v10 = vpop.f32.mrb[9].mxu1  ;;  %v1445_v14 = vmul.f32 %v2021_v8, %v1218_v20  ;;  %v1446_v0 = vmul.f32 %v2023_v1, %v1291_v7 }
 0x4a6   : > { %v1364_v12 = vpop.f32.mrb[4].mxu0  ;;  %v1437_v13 = vpop.f32.mrb[10].mxu1 }
 0x4a7   : > { %v1447_v16 = vmul.f32 %v2025_v11, %v1364_v12  ;;  %v1448_v17 = vmul.f32 %v2027_v15, %v1437_v13  ;;  %v1901_v19 = vpop.f32.mrb[5].mxu0  ;;  %v1906_v21 = vpop.f32.mrb[11].mxu1 }
 0x4a9   : > { %v1449_v22 = vcombine.low %v1445_v14, %v1447_v16  ;;  %v1450_v23 = vcombine.high %v1445_v14, %v1447_v16  ;;  %v1465_v24 = vcombine.low %v1446_v0, %v1448_v17  ;;  %v1466_v26 = vcombine.high %v1446_v0, %v1448_v17 }
 0x4ab   : > { %v1457_v27 = vrot.slane %v1449_v22, %v2446_v25  ;;  %v1464_v28 = vrot.slane %v1450_v23, %v2446_v25  ;;  %v1473_v29 = vrot.slane %v1465_v24, %v2446_v25  ;;  %v1480_v30 = vrot.slane %v1466_v26, %v2446_v25 }
 0x4ad   : > { %v1481_v31 = vcombine.low %v1457_v27, %v1473_v29  ;;  %v1482_v32 = vcombine.high %v1457_v27, %v1473_v29  ;;  %v1497_v34 = vcombine.low %v1464_v28, %v1480_v30  ;;  %v1498_v35 = vcombine.high %v1464_v28, %v1480_v30 }
 0x4af   : > { %v1489_v38 = vrot.slane %v1481_v31, %v2455_v33  ;;  %v1496_v39 = vrot.slane %v1482_v32, %v2455_v33  ;;  %v1505_v40 = vrot.slane %v1497_v34, %v2455_v33  ;;  %v1512_v41 = vrot.slane %v1498_v35, %v2455_v33 }
 0x4b1   : > { %v1517_v43 = vcombine.low %v1489_v38, %v1496_v39  ;;  %v1822_v44 = vcombine.high %v1489_v38, %v1496_v39  ;;  %v1533_v45 = vcombine.low %v1505_v40, %v1512_v41  ;;  %v1823_v46 = vcombine.high %v1505_v40, %v1512_v41 }
 0x4b3   : > { %v1524_v47 = vrot.slane %v1517_v43, %v2446_v25  ;;  %v1532_v48 = vrot.slane %v1822_v44, %v2446_v25  ;;  %v1540_v49 = vrot.slane %v1533_v45, %v2446_v25  ;;  %v1548_v50 = vrot.slane %v1823_v46, %v2446_v25 }
 0x4b5   : > { %v1550_v51 = vcombine.high %v1524_v47, %v1532_v48  ;;  %v1566_v52 = vcombine.high %v1540_v49, %v1548_v50  ;;  %v1549_v53 = vcombine.low %v1524_v47, %v1532_v48  ;;  %v1565_v54 = vcombine.low %v1540_v49, %v1548_v50 }
 0x4b7   : > { %v1564_v55 = vrot.slane %v1550_v51, %v2455_v33  ;;  %v1580_v18 = vrot.slane %v1566_v52, %v2455_v33  ;;  %v1557_v56 = vrot.slane %v1549_v53, %v2455_v33  ;;  %v1573_v57 = vrot.slane %v1565_v54, %v2455_v33 }
 0x4b9   : > { %v1583_v58 = vcombine.low %v1564_v55, %v1580_v18  ;;  %v1582_v59 = vcombine.high %v1557_v56, %v1573_v57  ;;  %v1584_v60 = vcombine.high %v1564_v55, %v1580_v18  ;;  %v1581_v61 = vcombine.low %v1557_v56, %v1573_v57 }
 0x4bb   : > { %1590 = vrot.lane.b32.xlu1 %v1583_v58, %s2201_s6  ;;  %1586 = vrot.lane.b32.xlu0 %v1582_v59, %s2202_s30 }
 0x4bf   : > { %1594 = vrot.lane.b32.xlu1 %v1584_v60, %s2203_s15 }
 0x52d   : > { %v1591_v25 = vpop.permute.xlu1 %1590  ;;  %v1587_v62 = vpop.permute.xlu0 %1586 }
 0x52e   : > { %v1597_v63 = vsel %vm797_vm2, %v1581_v61, %v1587_v62 }
 0x52f   : > { %v1599_v2 = vsel %vm1598_vm4, %v1597_v63, %v1591_v25 }
 0x531   : > { %v1595_v33 = vpop.permute.xlu1 %1594 }
 0x532   : > { %v1601_v3 = vsel %vm1600_vm5, %v1599_v2, %v1595_v33 }
 0x533   : > { %1916 = vmatmul.mubr.msk.f32.vlgmr.msra.gmra.mrb[6].mxu0 %vm281_vm1, %v1601_v3 }
 0x606   : > { %v1682_v5 = vpop.f32.mrb[6].mxu0 }
 0x607   : > { %v1683_v6 = vadd.f32 %v1824_v4, %v1682_v5  ;;  %v1917_v20 = vpop.f32.mrb[7].mxu0 }
 0x609   : > { %1686 = vst.msk [vmem:[%s268_s17] sm:$0xff] %vm281_vm1, %v1683_v6 }
 0x60a   : > { %2127 = shalt.err (!%p2124_p2)
}
 0x60b   : > { %s2128_s12 = scalar_lea.hbm %s2584_s10, 128  ;;  %s2132_s15 = scalar_lea.hbm %s2634_s5, 256 }
 0x60c   : > { %p2129_p13 = scmp.ne.s32.totalorder %s2584_s10, %s2128_s12  ;;  %p2133_p4 = scmp.lt.u32.totalorder %s2584_s10, %s2634_s5 }
 0x60d   : > { %p2134_p5 = scmp.lt.u32.totalorder %s2132_s15, %s2128_s12  ;;  %p2136_p11 = scmp.lt.u32.totalorder %s2128_s12, %s2584_s10 }
 0x60e   : > { %p2130_p6 = pnand %p2129_p13, %p2648_p0 }
 0x60f   : > { %p2135_p8 = por %p2134_p5, %p2133_p4 }
 0x610   : > { %p2131_p10 = pneg %p2130_p6 }
 0x611   : > { %p2137_p1 = por %p2136_p11, %p2135_p8 }
 0x613   : > { %p2138_p3 = pnand %p2137_p1, %p2131_p10 }
 0x615   : > { %2141 = shalt.err (!%p2138_p3)
}
 0x616   : > { %1940 = dma.vmem_to_hbm [thread:$0]  (%p2648_p0), %s2586_s24, 128, %s2584_s10, %s1688_s11  }
 0x617 PF: > { %s1713_s29 = sand.u32 1, %s2172_s18   ;;  %p2649_p7 = scmp.ne.s32.totalorder %s2639_s25, 0 }
 0x618   : > { %p2650_p9 = scmp.ge.s32.totalorder %s2184_s21, 2  ;;  %s1714_s17 = scalar_lea.sflag [#allocation4], %s1713_s29 }
 0x61a   : > { %p1954_p12 = pnand %p2650_p9, %p2649_p7 }
 0x61c   : > { %2167 = dma.done.wait (!%p1954_p12), %s1714_s17, 128  }
 0x61d   : > { %2169 = vsyncadd (!%p1954_p12), %s1714_s17, 4294967168  ;;  %p19_p2 = scmp.ge.s32.totalorder %s2345_s14, 4   ;;  %s2651_s18 = smov %s2176_s19 }
 0x61e   : > { %s2652_s19 = smov %s2180_s20  ;;  %s2653_s20 = smov %s2361_s27 }
 0x61f   : > { %s2654_s21 = smov %s2345_s14  ;;  %21 = sbr.rel (!%p19_p2) target bundleno = 6 (0x6), region = 93 }
 0x626   :  { %1719 = vsyncpa [#allocation3], 1 }
 0x627   :  { %1721 = vsyncpa [#allocation3 + $0x1], 1 }
 0x628   :  { %1722 = vsyncpa [#allocation6], 1 }
 0x629   :  { %1723 = vsyncpa [#allocation4], 1 }
 0x62a   :  { %1725 = vsyncpa [#allocation4 + $0x1], 1 }

</bundles_post_ra>
